<compile_context>
chip_gen: v5e
topology: v5e:2x2
jax: 0.10.0
libtpu: 0.0.40
codegen_flags: <defaults>
</compile_context>

<pallas_src>
import functools

import numpy as np
import jax
import jax.numpy as jnp
from jax import lax
from jax.experimental import pallas as pl
from jax.experimental.pallas import tpu as pltpu

EPS = -9.0


def _dgauss_kernel(h_ref, w_ref, aff_ref, out_ref):
    """One grid step = NB images.

    h_ref   : VMEM (NB, C_in, HW) block, dtype of the incoming activations
    w_ref   : VMEM (8, C_in) fused weights; row 0 = x_loc, row 1 = x_logscale
              (rows 2..7 are zero padding for a clean sublane layout)
    aff_ref : VMEM (2, 3) f32; col 0 = bias, col 1 = clamp floor ([-inf, EPS]),
              col 2 = post-clamp add ([0, log(t)])
    out_ref : VMEM (NB, 2, HW) f32; row 0 = loc, row 1 = logscale
    """
    w = w_ref[...]                      # (8, C_in) — hoisted out of the loop
    bias = aff_ref[:, 0:1]              # (2, 1)
    floor = aff_ref[:, 1:2]             # (2, 1)  [-inf, EPS]
    post = aff_ref[:, 2:3]              # (2, 1)  [0, log(t)]

    nb = h_ref.shape[0]

    def body(i, carry):
        # (8, C_in) x (C_in, HW) -> (8, HW); f32 accumulation on the MXU.
        acc = jnp.dot(w, h_ref[i], preferred_element_type=jnp.float32)
        # Rows 0/1 = loc/logscale.  Bias, clamp (only row 1 via per-row floor),
        # then + log(t): clamp-before-temperature, matching the PyTorch order.
        out_ref[i] = jnp.maximum(acc[0:2, :] + bias, floor) + post
        return carry

    lax.fori_loop(0, nb, body, 0, unroll=True)


def prepare_params(w_loc, b_loc, w_ls, b_ls, *, t=None, compute_dtype=jnp.float32):
    """Build kernel operands from DGaussNet parameters.

    Call ONCE per parameter set / temperature, NOT per forward call.

    w_loc, w_ls : (C_in, 1) or (C_in,)  (PyTorch conv weight (1, C_in, 1, 1) squeezed)
    b_loc, b_ls : (1,) biases
    t           : optional python float temperature (logscale += log(t), after clamp)
    compute_dtype: dtype the activations h will arrive in (f32 or bf16)
    """
    wl = jnp.asarray(w_loc).reshape(-1)
    ws = jnp.asarray(w_ls).reshape(-1)
    assert wl.shape == ws.shape, "loc / logscale heads must share C_in"
    w2 = jnp.stack([wl, ws], axis=0).astype(compute_dtype)     # (2, C_in)
    # Rows 2..7 must stay exactly zero (result rows 2..7 are sliced off anyway).
    w_fused = jnp.pad(w2, ((0, 6), (0, 0)))                    # (8, C_in)

    log_t = 0.0 if t is None else float(np.log(t))
    bias_col = jnp.concatenate([jnp.asarray(b_loc).reshape(1),
                                jnp.asarray(b_ls).reshape(1)]).astype(jnp.float32)
    floor_col = jnp.array([-jnp.inf, EPS], jnp.float32)        # clamp only the logscale row
    post_col = jnp.array([0.0, log_t], jnp.float32)
    aff = jnp.stack([bias_col, floor_col, post_col], axis=1)   # (2, 3) f32
    return w_fused, aff


def _pick_block_images(n, c_in, hw, itemsize, target_block_bytes=2 << 20):
    """Images per grid step: large enough to amortize the ~0.35us/step overhead,
    small enough that the double-buffered input block fits v7x's VMEM budget,
    and leaving >= 2 grid steps so both v7x TensorCores get work."""
    per_image = max(1, c_in * hw * itemsize)
    nb = max(1, target_block_bytes // per_image)
    if n >= 2:
        nb = min(nb, (n + 1) // 2)      # keep >= 2 grid steps (v7x megacore)
    return int(min(nb, n))


@functools.partial(jax.jit, static_argnames=("block_images",))
def dgauss_forward(h_nchw, w_fused, aff, *, block_images=None):
    """Forward pass of DGaussNet (input_channels == 1 case).

    h_nchw : (N, C_in, H, W), f32 or bf16 (no wrapper-side cast is performed)
    w_fused, aff : from prepare_params()
    returns (loc, logscale), both (N, 1, H, W) float32
    """
    n, c_in, hgt, wid = h_nchw.shape
    hw = hgt * wid
    assert w_fused.shape == (8, c_in)

    # Free reshape: NCHW layout kept; the spatial axis becomes the lane axis.
    h3 = h_nchw.reshape(n, c_in, hw)

    nb = block_images if block_images is not None else _pick_block_images(
        n, c_in, hw, h_nchw.dtype.itemsize)
    grid = (pl.cdiv(n, nb),)

    fused = pl.pallas_call(
        _dgauss_kernel,
        out_shape=jax.ShapeDtypeStruct((n, 2, hw), jnp.float32),
        grid_spec=pltpu.PrefetchScalarGridSpec(
            num_scalar_prefetch=0,
            grid=grid,
            in_specs=[
                pl.BlockSpec((nb, c_in, hw), lambda g: (g, 0, 0)),   # activations
                pl.BlockSpec((8, c_in), lambda g: (0, 0)),           # fused weights
                pl.BlockSpec((2, 3), lambda g: (0, 0)),              # bias/floor/post table
            ],
            out_specs=pl.BlockSpec((nb, 2, hw), lambda g: (g, 0, 0)),
        ),
        compiler_params=pltpu.CompilerParams(
            dimension_semantics=("parallel",),
        ),
    )(h3, w_fused, aff)

    # Slice the two heads back out; under jit these fuse with downstream consumers.
    loc = fused[:, 0, :].reshape(n, 1, hgt, wid)
    logscale = fused[:, 1, :].reshape(n, 1, hgt, wid)
    return loc, logscale


def reference_forward(h_nchw, w_loc, b_loc, w_ls, b_ls, *, t=None):
    # Pure-JAX reference of the 1x1-conv forward for sanity checking.
    loc = jnp.einsum("nchw,co->nohw", h_nchw, w_loc) + b_loc.reshape(1, -1, 1, 1)
    ls = jnp.einsum("nchw,co->nohw", h_nchw, w_ls) + b_ls.reshape(1, -1, 1, 1)
    ls = jnp.maximum(ls, EPS)
    if t is not None:
        ls = ls + jnp.float32(np.log(t))
    return loc, ls


if __name__ == "__main__":
    # Module params (synthetic, deterministic): widths[0]=32 hidden channels,
    # 1 output channel (MorphoMNIST is grayscale), std_init=1.0, diag covariance.
    params = {"widths": [32], "input_channels": 1, "std_init": 1.0,
              "x_like": "diag_dgauss"}
    C_in = params["widths"][0]
    C_out = params["input_channels"]
    N, H, W = 8, 16, 16

    key = jax.random.PRNGKey(0)
    k_h, k_wl, k_bl, k_hb = jax.random.split(key, 4)

    h = jax.random.normal(k_h, (N, C_in, H, W), dtype=jnp.float32)

    # x_loc conv: kaiming-uniform-like deterministic init (bound = 1/sqrt(C_in)).
    bound = 1.0 / np.sqrt(C_in)
    w_loc = jax.random.uniform(k_wl, (C_in, C_out), jnp.float32, -bound, bound)
    b_loc = jax.random.uniform(k_bl, (C_out,), jnp.float32, -bound, bound)

    # x_logscale conv: std_init > 0  =>  weight = 0, bias = log(std_init).
    w_ls = jnp.zeros((C_in, C_out), jnp.float32)
    b_ls = jnp.full((C_out,), np.log(params["std_init"]), jnp.float32)

    # ---- f32 path ----------------------------------------------------------
    w_fused, aff = prepare_params(w_loc, b_loc, w_ls, b_ls)       # once per param set
    loc, logscale = dgauss_forward(h, w_fused, aff)
    jax.block_until_ready((loc, logscale))
    loc_r, ls_r = reference_forward(h, w_loc, b_loc, w_ls, b_ls)
    np.testing.assert_allclose(np.asarray(loc), np.asarray(loc_r), rtol=1e-5, atol=1e-5)
    np.testing.assert_allclose(np.asarray(logscale), np.asarray(ls_r), rtol=1e-5, atol=1e-5)
    assert loc.shape == (N, C_out, H, W) and logscale.shape == (N, C_out, H, W)

    # ---- temperature path (clamp to EPS first, then + log(t), as in PyTorch) ----
    w_fused_t, aff_t = prepare_params(w_loc, b_loc, w_ls, b_ls, t=0.7)
    loc_t, ls_t = dgauss_forward(h, w_fused_t, aff_t)
    jax.block_until_ready((loc_t, ls_t))
    loc_tr, ls_tr = reference_forward(h, w_loc, b_loc, w_ls, b_ls, t=0.7)
    np.testing.assert_allclose(np.asarray(loc_t), np.asarray(loc_tr), rtol=1e-5, atol=1e-5)
    np.testing.assert_allclose(np.asarray(ls_t), np.asarray(ls_tr), rtol=1e-5, atol=1e-5)

    # ---- bf16 activations: only valid when h ALREADY arrives in bf16 from the
    # producing decoder layer; no wrapper-side cast is performed here. --------
    h_bf16 = jax.random.normal(k_hb, (N, C_in, H, W), dtype=jnp.bfloat16)
    w_fused_b, aff_b = prepare_params(w_loc, b_loc, w_ls, b_ls,
                                      compute_dtype=jnp.bfloat16)
    loc_b, ls_b = dgauss_forward(h_bf16, w_fused_b, aff_b)
    jax.block_until_ready((loc_b, ls_b))
    h_up = h_bf16.astype(jnp.float32)
    w_loc_up = w_loc.astype(jnp.bfloat16).astype(jnp.float32)
    w_ls_up = w_ls.astype(jnp.bfloat16).astype(jnp.float32)
    loc_br, ls_br = reference_forward(h_up, w_loc_up, b_loc, w_ls_up, b_ls)
    np.testing.assert_allclose(np.asarray(loc_b), np.asarray(loc_br), rtol=1e-2, atol=1e-2)
    np.testing.assert_allclose(np.asarray(ls_b), np.asarray(ls_br), rtol=1e-2, atol=1e-2)

    print("KERNEL_OK")
</pallas_src>

<mosaic_0001>
module attributes {stable_mosaic.version = 11 : i64} {
  func.func @_dgauss_kernel(%arg0: i32, %arg1: memref<4x32x256xf32, #tpu.memory_space<vmem>>, %arg2: memref<8x32xf32, #tpu.memory_space<vmem>>, %arg3: memref<2x3xf32, #tpu.memory_space<vmem>>, %arg4: memref<4x2x256xf32, #tpu.memory_space<vmem>>) attributes {dimension_semantics = [#tpu.dimension_semantics<parallel>], iteration_bounds = array<i64: 2>, scalar_prefetch = 0 : i64, scratch_operands = 0 : i64, tpu.core_type = #tpu.core_type<tc>, window_params = [{transform_indices = @transform_0, window_bounds = array<i64: 4, 32, 256>}, {pipeline_mode = #tpu.pipeline_mode<synchronous>, transform_indices = @transform_1, window_bounds = array<i64: 8, 32>}, {pipeline_mode = #tpu.pipeline_mode<synchronous>, transform_indices = @transform_2, window_bounds = array<i64: 2, 3>}, {transform_indices = @transform_3, window_bounds = array<i64: 4, 2, 256>}]} {
    %c0 = arith.constant 0 : index
    %c0_0 = arith.constant 0 : index
    %0 = vector.load %arg2[%c0, %c0_0] : memref<8x32xf32, #tpu.memory_space<vmem>>, vector<8x32xf32>
    %c0_1 = arith.constant 0 : index
    %c0_2 = arith.constant 0 : index
    %1 = vector.load %arg3[%c0_1, %c0_2] : memref<2x3xf32, #tpu.memory_space<vmem>>, vector<2x1xf32>
    %c0_3 = arith.constant 0 : index
    %c1 = arith.constant 1 : index
    %2 = vector.load %arg3[%c0_3, %c1] : memref<2x3xf32, #tpu.memory_space<vmem>>, vector<2x1xf32>
    %c0_4 = arith.constant 0 : index
    %c2 = arith.constant 2 : index
    %3 = vector.load %arg3[%c0_4, %c2] : memref<2x3xf32, #tpu.memory_space<vmem>>, vector<2x1xf32>
    %c0_i32 = arith.constant 0 : i32
    %4 = arith.index_cast %c0_i32 : i32 to index
    %c0_5 = arith.constant 0 : index
    %c0_6 = arith.constant 0 : index
    %5 = vector.load %arg1[%4, %c0_5, %c0_6] : memref<4x32x256xf32, #tpu.memory_space<vmem>>, vector<1x32x256xf32>
    %6 = vector.shape_cast %5 : vector<1x32x256xf32> to vector<32x256xf32>
    %cst = arith.constant dense<0.000000e+00> : vector<8x256xf32>
    %7 = tpu.matmul %0, %6, %cst {dimension_numbers = #tpu.dot_dimension_numbers<[1], [0], [0], [1], [0, 0, 1, 1], [], []>} : vector<8x32xf32>, vector<32x256xf32>, vector<8x256xf32> -> vector<8x256xf32>
    %8 = vector.extract_strided_slice %7 {offsets = [0, 0], sizes = [2, 256], strides = [1, 1]} : vector<8x256xf32> to vector<2x256xf32>
    %9 = vector.broadcast %1 : vector<2x1xf32> to vector<2x256xf32>
    %10 = arith.addf %8, %9 : vector<2x256xf32>
    %11 = vector.broadcast %2 : vector<2x1xf32> to vector<2x256xf32>
    %12 = arith.maximumf %10, %11 : vector<2x256xf32>
    %13 = vector.broadcast %3 : vector<2x1xf32> to vector<2x256xf32>
    %14 = arith.addf %12, %13 : vector<2x256xf32>
    %15 = arith.index_cast %c0_i32 : i32 to index
    %c0_7 = arith.constant 0 : index
    %c0_8 = arith.constant 0 : index
    %16 = vector.load %arg4[%15, %c0_7, %c0_8] : memref<4x2x256xf32, #tpu.memory_space<vmem>>, vector<1x2x256xf32>
    %17 = vector.shape_cast %16 : vector<1x2x256xf32> to vector<2x256xf32>
    %18 = vector.shape_cast %14 : vector<2x256xf32> to vector<1x2x256xf32>
    tpu.vector_store %arg4[%15, %c0_7, %c0_8], %18 {strides = array<i32>} : memref<4x2x256xf32, #tpu.memory_space<vmem>>, vector<1x2x256xf32>,
    %c1_i32 = arith.constant 1 : i32
    %19 = arith.index_cast %c1_i32 : i32 to index
    %c0_9 = arith.constant 0 : index
    %c0_10 = arith.constant 0 : index
    %20 = vector.load %arg1[%19, %c0_9, %c0_10] : memref<4x32x256xf32, #tpu.memory_space<vmem>>, vector<1x32x256xf32>
    %21 = vector.shape_cast %20 : vector<1x32x256xf32> to vector<32x256xf32>
    %cst_11 = arith.constant dense<0.000000e+00> : vector<8x256xf32>
    %22 = tpu.matmul %0, %21, %cst_11 {dimension_numbers = #tpu.dot_dimension_numbers<[1], [0], [0], [1], [0, 0, 1, 1], [], []>} : vector<8x32xf32>, vector<32x256xf32>, vector<8x256xf32> -> vector<8x256xf32>
    %23 = vector.extract_strided_slice %22 {offsets = [0, 0], sizes = [2, 256], strides = [1, 1]} : vector<8x256xf32> to vector<2x256xf32>
    %24 = vector.broadcast %1 : vector<2x1xf32> to vector<2x256xf32>
    %25 = arith.addf %23, %24 : vector<2x256xf32>
    %26 = vector.broadcast %2 : vector<2x1xf32> to vector<2x256xf32>
    %27 = arith.maximumf %25, %26 : vector<2x256xf32>
    %28 = vector.broadcast %3 : vector<2x1xf32> to vector<2x256xf32>
    %29 = arith.addf %27, %28 : vector<2x256xf32>
    %30 = arith.index_cast %c1_i32 : i32 to index
    %c0_12 = arith.constant 0 : index
    %c0_13 = arith.constant 0 : index
    %31 = vector.load %arg4[%30, %c0_12, %c0_13] : memref<4x2x256xf32, #tpu.memory_space<vmem>>, vector<1x2x256xf32>
    %32 = vector.shape_cast %31 : vector<1x2x256xf32> to vector<2x256xf32>
    %33 = vector.shape_cast %29 : vector<2x256xf32> to vector<1x2x256xf32>
    tpu.vector_store %arg4[%30, %c0_12, %c0_13], %33 {strides = array<i32>} : memref<4x2x256xf32, #tpu.memory_space<vmem>>, vector<1x2x256xf32>,
    %c2_i32 = arith.constant 2 : i32
    %34 = arith.index_cast %c2_i32 : i32 to index
    %c0_14 = arith.constant 0 : index
    %c0_15 = arith.constant 0 : index
    %35 = vector.load %arg1[%34, %c0_14, %c0_15] : memref<4x32x256xf32, #tpu.memory_space<vmem>>, vector<1x32x256xf32>
    %36 = vector.shape_cast %35 : vector<1x32x256xf32> to vector<32x256xf32>
    %cst_16 = arith.constant dense<0.000000e+00> : vector<8x256xf32>
    %37 = tpu.matmul %0, %36, %cst_16 {dimension_numbers = #tpu.dot_dimension_numbers<[1], [0], [0], [1], [0, 0, 1, 1], [], []>} : vector<8x32xf32>, vector<32x256xf32>, vector<8x256xf32> -> vector<8x256xf32>
    %38 = vector.extract_strided_slice %37 {offsets = [0, 0], sizes = [2, 256], strides = [1, 1]} : vector<8x256xf32> to vector<2x256xf32>
    %39 = vector.broadcast %1 : vector<2x1xf32> to vector<2x256xf32>
    %40 = arith.addf %38, %39 : vector<2x256xf32>
    %41 = vector.broadcast %2 : vector<2x1xf32> to vector<2x256xf32>
    %42 = arith.maximumf %40, %41 : vector<2x256xf32>
    %43 = vector.broadcast %3 : vector<2x1xf32> to vector<2x256xf32>
    %44 = arith.addf %42, %43 : vector<2x256xf32>
    %45 = arith.index_cast %c2_i32 : i32 to index
    %c0_17 = arith.constant 0 : index
    %c0_18 = arith.constant 0 : index
    %46 = vector.load %arg4[%45, %c0_17, %c0_18] : memref<4x2x256xf32, #tpu.memory_space<vmem>>, vector<1x2x256xf32>
    %47 = vector.shape_cast %46 : vector<1x2x256xf32> to vector<2x256xf32>
    %48 = vector.shape_cast %44 : vector<2x256xf32> to vector<1x2x256xf32>
    tpu.vector_store %arg4[%45, %c0_17, %c0_18], %48 {strides = array<i32>} : memref<4x2x256xf32, #tpu.memory_space<vmem>>, vector<1x2x256xf32>,
    %c3_i32 = arith.constant 3 : i32
    %49 = arith.index_cast %c3_i32 : i32 to index
    %c0_19 = arith.constant 0 : index
    %c0_20 = arith.constant 0 : index
    %50 = vector.load %arg1[%49, %c0_19, %c0_20] : memref<4x32x256xf32, #tpu.memory_space<vmem>>, vector<1x32x256xf32>
    %51 = vector.shape_cast %50 : vector<1x32x256xf32> to vector<32x256xf32>
    %cst_21 = arith.constant dense<0.000000e+00> : vector<8x256xf32>
    %52 = tpu.matmul %0, %51, %cst_21 {dimension_numbers = #tpu.dot_dimension_numbers<[1], [0], [0], [1], [0, 0, 1, 1], [], []>} : vector<8x32xf32>, vector<32x256xf32>, vector<8x256xf32> -> vector<8x256xf32>
    %53 = vector.extract_strided_slice %52 {offsets = [0, 0], sizes = [2, 256], strides = [1, 1]} : vector<8x256xf32> to vector<2x256xf32>
    %54 = vector.broadcast %1 : vector<2x1xf32> to vector<2x256xf32>
    %55 = arith.addf %53, %54 : vector<2x256xf32>
    %56 = vector.broadcast %2 : vector<2x1xf32> to vector<2x256xf32>
    %57 = arith.maximumf %55, %56 : vector<2x256xf32>
    %58 = vector.broadcast %3 : vector<2x1xf32> to vector<2x256xf32>
    %59 = arith.addf %57, %58 : vector<2x256xf32>
    %60 = arith.index_cast %c3_i32 : i32 to index
    %c0_22 = arith.constant 0 : index
    %c0_23 = arith.constant 0 : index
    %61 = vector.load %arg4[%60, %c0_22, %c0_23] : memref<4x2x256xf32, #tpu.memory_space<vmem>>, vector<1x2x256xf32>
    %62 = vector.shape_cast %61 : vector<1x2x256xf32> to vector<2x256xf32>
    %63 = vector.shape_cast %59 : vector<2x256xf32> to vector<1x2x256xf32>
    tpu.vector_store %arg4[%60, %c0_22, %c0_23], %63 {strides = array<i32>} : memref<4x2x256xf32, #tpu.memory_space<vmem>>, vector<1x2x256xf32>,
    %c4_i32 = arith.constant 4 : i32
    return
  }
  func.func @transform_0(%arg0: i32) -> (i32, i32, i32) {
    %c0_i32 = arith.constant 0 : i32
    %c0_i32_0 = arith.constant 0 : i32
    %c0_i32_1 = arith.constant 0 : i32
    return %arg0, %c0_i32, %c0_i32_0 : i32, i32, i32
  }
  func.func @transform_1(%arg0: i32) -> (i32, i32) {
    %c0_i32 = arith.constant 0 : i32
    %c0_i32_0 = arith.constant 0 : i32
    %c0_i32_1 = arith.constant 0 : i32
    return %c0_i32, %c0_i32_0 : i32, i32
  }
  func.func @transform_2(%arg0: i32) -> (i32, i32) {
    %c0_i32 = arith.constant 0 : i32
    %c0_i32_0 = arith.constant 0 : i32
    %c0_i32_1 = arith.constant 0 : i32
    return %c0_i32, %c0_i32_0 : i32, i32
  }
  func.func @transform_3(%arg0: i32) -> (i32, i32, i32) {
    %c0_i32 = arith.constant 0 : i32
    %c0_i32_0 = arith.constant 0 : i32
    %c0_i32_1 = arith.constant 0 : i32
    return %arg0, %c0_i32, %c0_i32_0 : i32, i32, i32
  }
}

</mosaic_0001>

<bundles_post_ra>
// kernel: squeeze.3
= control target key start
LH: loop header
LB: loop body
LE: loop exit
PB: predicated region body
PF: predicated region fallthrough
CT: control target
= control target key end

     0   :  { %s193_s8 = smov 96   ;;  %s194_s9 = smov 112   ;;  %s262_s0 = inlined_call_operand.vmem [shape: f32[8,256], index: 0, kind: input, shape index: {}]   ;;  %s263_s1 = inlined_call_operand.hbm [shape: f32[8,1,16,16], index: 1, kind: output, shape index: {}]  }
   0x1   :  { %v37_v0 = vld.sshfl [vmem:[%s262_s0] sm:$0xff pattern:$0xb3a29180]  }
   0x2   :  { %38 = vrot.lane.b32.xlu1 %v37_v0, %s193_s8  ;;  %21 = vrot.lane.b32.xlu0 %v37_v0, %s194_s9 }
   0x3   :  { %2 = vsyncpa [#allocation1], 0  ;;  %s195_s10 = smov 80   ;;  %v153_v1 = vld.sshfl [vmem:[%s262_s0 + $0x4] sm:$0xff pattern:$0xb3a29180]  }
   0x4   :  { %55 = vrot.lane.b32.xlu2 %v37_v0, %s195_s10  ;;  %s196_s13 = smov 64   ;;  %s197_s14 = smov 48   ;;  %vm4_vm0 = vcmask 130048   ;;  %v3_v8 = vld [vmem:[%s262_s0] sm:$0xff]   ;;  %v151_v11 = vld [vmem:[%s262_s0 + $0x8] sm:$0xff]  }
   0x5   :  { %s198_s15 = smov 32   ;;  %s199_s16 = smov 16   ;;  %5 = vst.msk [vmem:[#allocation0] ss:$16 sm:$0x3] %vm4_vm0, %v3_v8  }
   0x6   :  { %6 = vst.msk [vmem:[#allocation0] ss:$16 sm:$0xc] %vm4_vm0, %v3_v8   ;;  %s200_s0 = smov [#allocation0]   ;;  %s144_s1 = sshll.u32 %s263_s1, 4  ;;  %s145_s1 = int_to_ptr.hbm [resolvable:$true] %s144_s1 }
   0x7   :  { %7 = vst.msk [vmem:[#allocation0] ss:$16 sm:$0x30] %vm4_vm0, %v3_v8   ;;  %s142_s21 = sshll.u32 %s200_s0, 4  ;;  %s143_s21 = int_to_ptr.vmem [resolvable:$true] %s142_s21 }
   0x8   :  { %8 = vst.msk [vmem:[#allocation0] ss:$16 sm:$0xc0] %vm4_vm0, %v3_v8  }
   0x9   :  { %13 = vst.msk [vmem:[#allocation0 + $0x8] ss:$16 sm:$0x3] %vm4_vm0, %v151_v11  }
   0xa   :  { %47 = vrot.lane.b32.xlu1 %v153_v1, %s193_s8  ;;  %30 = vrot.lane.b32.xlu0 %v153_v1, %s194_s9  ;;  %15 = vst.msk [vmem:[#allocation0 + $0x8] ss:$16 sm:$0xc] %vm4_vm0, %v151_v11  }
   0xb   :  { %17 = vst.msk [vmem:[#allocation0 + $0x8] ss:$16 sm:$0x30] %vm4_vm0, %v151_v11  }
   0xc   :  { %64 = vrot.lane.b32.xlu2 %v153_v1, %s195_s10  ;;  %19 = vst.msk [vmem:[#allocation0 + $0x8] ss:$16 sm:$0xc0] %vm4_vm0, %v151_v11  }
  0x12   :  { %81 = vrot.lane.b32.xlu1 %v153_v1, %s196_s13  ;;  %72 = vrot.lane.b32.xlu0 %v37_v0, %s196_s13 }
  0x14   :  { %89 = vrot.lane.b32.xlu2 %v37_v0, %s197_s14 }
  0x1a   :  { %106 = vrot.lane.b32.xlu1 %v37_v0, %s198_s15  ;;  %98 = vrot.lane.b32.xlu0 %v153_v1, %s197_s14 }
  0x1c   :  { %115 = vrot.lane.b32.xlu2 %v153_v1, %s198_s15 }
  0x22   :  { %132 = vrot.lane.b32.xlu1 %v153_v1, %s199_s16  ;;  %123 = vrot.lane.b32.xlu0 %v37_v0, %s199_s16 }
  0x5e   :  { %v56_v2 = vpop.permute.xlu2 %55  }
  0x5f   :  { %59 = vst.msk [vmem:[#allocation0 + $0x3] ss:$8 sm:$0xf] %vm4_vm0, %v56_v2  }
  0x60   :  { %61 = vst.msk [vmem:[#allocation0 + $0x3] ss:$8 sm:$0xf0] %vm4_vm0, %v56_v2  }
  0x66   :  { %v65_v3 = vpop.permute.xlu2 %64  }
  0x67   :  { %68 = vst.msk [vmem:[#allocation0 + $0x43] ss:$8 sm:$0xf] %vm4_vm0, %v65_v3  }
  0x68   :  { %70 = vst.msk [vmem:[#allocation0 + $0x43] ss:$8 sm:$0xf0] %vm4_vm0, %v65_v3  }
  0x6e   :  { %v90_v4 = vpop.permute.xlu2 %89  }
  0x6f   :  { %93 = vst.msk [vmem:[#allocation0 + $0x5] ss:$8 sm:$0xf] %vm4_vm0, %v90_v4  }
  0x70   :  { %95 = vst.msk [vmem:[#allocation0 + $0x5] ss:$8 sm:$0xf0] %vm4_vm0, %v90_v4  }
  0x74   :  { %v39_v5 = vpop.permute.xlu1 %38   ;;  %v22_v6 = vpop.permute.xlu0 %21  }
  0x75   :  { %42 = vst.msk [vmem:[#allocation0 + $0x2] ss:$8 sm:$0xf] %vm4_vm0, %v39_v5  }
  0x76   :  { %44 = vst.msk [vmem:[#allocation0 + $0x2] ss:$8 sm:$0xf0] %vm4_vm0, %v39_v5   ;;  %v116_v7 = vpop.permute.xlu2 %115  }
  0x77   :  { %25 = vst.msk [vmem:[#allocation0 + $0x1] ss:$8 sm:$0xf] %vm4_vm0, %v22_v6  }
  0x78   :  { %27 = vst.msk [vmem:[#allocation0 + $0x1] ss:$8 sm:$0xf0] %vm4_vm0, %v22_v6  }
  0x79   :  { %119 = vst.msk [vmem:[#allocation0 + $0x46] ss:$8 sm:$0xf] %vm4_vm0, %v116_v7  }
  0x7a   :  { %121 = vst.msk [vmem:[#allocation0 + $0x46] ss:$8 sm:$0xf0] %vm4_vm0, %v116_v7  }
  0x7c   :  { %v48_v9 = vpop.permute.xlu1 %47   ;;  %v31_v10 = vpop.permute.xlu0 %30  }
  0x7d   :  { %51 = vst.msk [vmem:[#allocation0 + $0x42] ss:$8 sm:$0xf] %vm4_vm0, %v48_v9  }
  0x7e   :  { %53 = vst.msk [vmem:[#allocation0 + $0x42] ss:$8 sm:$0xf0] %vm4_vm0, %v48_v9  }
  0x7f   :  { %34 = vst.msk [vmem:[#allocation0 + $0x41] ss:$8 sm:$0xf] %vm4_vm0, %v31_v10  }
  0x80   :  { %36 = vst.msk [vmem:[#allocation0 + $0x41] ss:$8 sm:$0xf0] %vm4_vm0, %v31_v10  }
  0x84   :  { %v82_v12 = vpop.permute.xlu1 %81   ;;  %v73_v13 = vpop.permute.xlu0 %72  }
  0x85   :  { %85 = vst.msk [vmem:[#allocation0 + $0x44] ss:$8 sm:$0xf] %vm4_vm0, %v82_v12  }
  0x86   :  { %87 = vst.msk [vmem:[#allocation0 + $0x44] ss:$8 sm:$0xf0] %vm4_vm0, %v82_v12  }
  0x87   :  { %76 = vst.msk [vmem:[#allocation0 + $0x4] ss:$8 sm:$0xf] %vm4_vm0, %v73_v13  }
  0x88   :  { %78 = vst.msk [vmem:[#allocation0 + $0x4] ss:$8 sm:$0xf0] %vm4_vm0, %v73_v13  }
  0x8c   :  { %v107_v14 = vpop.permute.xlu1 %106   ;;  %v99_v15 = vpop.permute.xlu0 %98  }
  0x8d   :  { %110 = vst.msk [vmem:[#allocation0 + $0x6] ss:$8 sm:$0xf] %vm4_vm0, %v107_v14  }
  0x8e   :  { %112 = vst.msk [vmem:[#allocation0 + $0x6] ss:$8 sm:$0xf0] %vm4_vm0, %v107_v14  }
  0x8f   :  { %102 = vst.msk [vmem:[#allocation0 + $0x45] ss:$8 sm:$0xf] %vm4_vm0, %v99_v15  }
  0x90   :  { %104 = vst.msk [vmem:[#allocation0 + $0x45] ss:$8 sm:$0xf0] %vm4_vm0, %v99_v15  }
  0x94   :  { %v133_v16 = vpop.permute.xlu1 %132   ;;  %v124_v17 = vpop.permute.xlu0 %123  }
  0x95   :  { %136 = vst.msk [vmem:[#allocation0 + $0x47] ss:$8 sm:$0xf] %vm4_vm0, %v133_v16  }
  0x96   :  { %138 = vst.msk [vmem:[#allocation0 + $0x47] ss:$8 sm:$0xf0] %vm4_vm0, %v133_v16  }
  0x97   :  { %127 = vst.msk [vmem:[#allocation0 + $0x7] ss:$8 sm:$0xf] %vm4_vm0, %v124_v17  }
  0x98   :  { %129 = vst.msk [vmem:[#allocation0 + $0x7] ss:$8 sm:$0xf0] %vm4_vm0, %v124_v17  }
  0x99   :  { %147 = dma.vmem_to_hbm [thread:$0]  %s143_s21, 2048, %s145_s1, [#allocation1]  }
  0x9a   :  { %191 = dma.done.wait [#allocation1], 2048  }
  0x9b   :  { %192 = vsyncadd [#allocation1], 4294965248 }
  0x9c   :  { %150 = vsyncpa [#allocation1], 1 }

// kernel: dgauss_forward.1
= control target key start
LH: loop header
LB: loop body
LE: loop exit
PB: predicated region body
PF: predicated region fallthrough
CT: control target
= control target key end

     0   :  { %s599_s12 = smov 0   ;;  %s685_s0 = inlined_call_operand.vmem [shape: f32[8,32,256], index: 0, kind: input, shape index: {}]   ;;  %s686_s1 = inlined_call_operand.vmem [shape: f32[8,32], index: 1, kind: input, shape index: {}]   ;;  %s687_s2 = inlined_call_operand.vmem [shape: f32[2,3], index: 2, kind: input, shape index: {}]   ;;  %s688_s3 = inlined_call_operand.vmem [shape: f32[8,2,256], index: 3, kind: output, shape index: {}]  }
   0x1 LB: > { %s503_s13 = sadd.s32 4294967295, %s574_s12   ;;  %p507_p0 = scmp.ge.s32.totalorder %s574_s12, 1  ;;  %s574_s12 = sphi %s599_s12, %s13_s12  }
   0x2   : > { %p139_p1 = scmp.lt.s32.totalorder %s574_s12, 3 }
   0x4   : > { %p140_p2 = pnand %p507_p0, %p139_p1 }
   0x5   : > { %s508_s14 = sshll.u32 (!%p140_p2), %s503_s13, 2 }
   0x6   : > { %143 = sbr.rel (%p140_p2) target bundleno = 176 (0xb0), region = 32  ;;  %p166_p3 = scmp.lt.s32.totalorder (!%p140_p2), %s508_s14, 7 }
   0xb   : > { %v610_v0 = vld [vmem:[%s687_s2] sm:$0x3]  ;;  %v576_v1 = vmov 0   ;;  %v577_v2 = vmov 2   ;;  %s690_s14 = smov (!%p166_p3, %s508_s14), 7  ;;  %vm189_vm0 = vcmask 261120  }
   0xc   : > { %564 = vset.pattern.permute.xlu0 %v576_v1  ;;  %566 = vset.pattern.permute.xlu1 %v577_v2  ;;  %s551_s17 = sshll.u32 %s690_s14, 6  ;;  %v179_v19 = vld [vmem:[%s686_s1] sm:$0xff]  ;;  %v578_v36 = vmov 1   ;;  %s552_s23 = sshll.u32 %s690_s14, 2  ;;  %vm255_vm1 = vcmask 1041408  }
   0xd   : > { %235 = vperm.xlu0 %564, %v610_v0   ;;  %247 = vperm.xlu1 %566, %v610_v0   ;;  %s621_s20 = scalar_lea.vmem %s685_s0, %s551_s17  ;;  %s672_s26 = scalar_lea.vmem %s688_s3, %s552_s23 }
   0xe   : > { %v187_v3 = vld [vmem:[%s621_s20 + $0x30] sm:$0xff]  ;;  %v188_v4 = vld [vmem:[%s621_s20 + $0x38] sm:$0xff]  ;;  %v185_v7 = vld [vmem:[%s621_s20 + $0x20] sm:$0xff] }
   0xf   : > { %v522_v5 = vld [vmem:[%s621_s20 + $0x70] sm:$0xff]  ;;  %205 = vmatpush.msra.mxu0 %v187_v3  ;;  %225 = vmatpush.msra.mxu1 %v188_v4  ;;  %v523_v6 = vld [vmem:[%s621_s20 + $0x78] sm:$0xff]  ;;  %v186_v8 = vld [vmem:[%s621_s20 + $0x28] sm:$0xff] }
  0x10   : > { %280 = vmatpush.msra.mxu2 %v522_v5  ;;  %300 = vmatpush.msra.mxu3 %v523_v6  ;;  %v520_v9 = vld [vmem:[%s621_s20 + $0x60] sm:$0xff]  ;;  %v521_v10 = vld [vmem:[%s621_s20 + $0x68] sm:$0xff]  ;;  %v183_v11 = vld [vmem:[%s621_s20 + $0x10] sm:$0xff] }
  0x11   : > { %206 = vmatpush.msra.mxu0 %v185_v7  ;;  %226 = vmatpush.msra.mxu1 %v186_v8  ;;  %v184_v12 = vld [vmem:[%s621_s20 + $0x18] sm:$0xff]  ;;  %v518_v13 = vld [vmem:[%s621_s20 + $0x50] sm:$0xff]  ;;  %v181_v15 = vld [vmem:[%s621_s20] sm:$0xff] }
  0x12   : > { %v519_v14 = vld [vmem:[%s621_s20 + $0x58] sm:$0xff]  ;;  %281 = vmatpush.msra.mxu2 %v520_v9  ;;  %301 = vmatpush.msra.mxu3 %v521_v10  ;;  %v182_v16 = vld [vmem:[%s621_s20 + $0x8] sm:$0xff]  ;;  %v516_v17 = vld [vmem:[%s621_s20 + $0x40] sm:$0xff] }
  0x13   : > { %207 = vmatpush.msra.mxu0 %v183_v11  ;;  %227 = vmatpush.msra.mxu1 %v184_v12  ;;  %v517_v18 = vld [vmem:[%s621_s20 + $0x48] sm:$0xff]  ;;  %v545_v20 = vld [vmem:[%s621_s20 + $0xf8] sm:$0xff]  ;;  %v533_v21 = vld [vmem:[%s621_s20 + $0xb0] sm:$0xff] }
  0x14   : > { %282 = vmatpush.msra.mxu2 %v518_v13  ;;  %302 = vmatpush.msra.mxu3 %v519_v14  ;;  %v534_v22 = vld [vmem:[%s621_s20 + $0xb8] sm:$0xff]  ;;  %v544_v23 = vld [vmem:[%s621_s20 + $0xf0] sm:$0xff]  ;;  %v543_v24 = vld [vmem:[%s621_s20 + $0xe8] sm:$0xff] }
  0x15   : > { %208 = vmatpush.msra.mxu0 %v181_v15  ;;  %228 = vmatpush.msra.mxu1 %v182_v16  ;;  %v531_v25 = vld [vmem:[%s621_s20 + $0xa0] sm:$0xff]  ;;  %v532_v26 = vld [vmem:[%s621_s20 + $0xa8] sm:$0xff]  ;;  %v541_v28 = vld [vmem:[%s621_s20 + $0xd8] sm:$0xff] }
  0x16   : > { %283 = vmatpush.msra.mxu2 %v516_v17  ;;  %303 = vmatpush.msra.mxu3 %v517_v18  ;;  %v542_v27 = vld [vmem:[%s621_s20 + $0xe0] sm:$0xff]  ;;  %v529_v29 = vld [vmem:[%s621_s20 + $0x90] sm:$0xff]  ;;  %v530_v30 = vld [vmem:[%s621_s20 + $0x98] sm:$0xff] }
  0x17   : > { %514 = vmatmul.msk.f32.vlgmr.msra.gmra.mxu0 %vm189_vm0, %v179_v19  ;;  %515 = vmatmul.msk.f32.vlgmr.msra.gmra.mxu1 %vm189_vm0, %v179_v19  ;;  %v540_v31 = vld [vmem:[%s621_s20 + $0xd0] sm:$0xff]  ;;  %v539_v32 = vld [vmem:[%s621_s20 + $0xc8] sm:$0xff]  ;;  %v527_v33 = vld [vmem:[%s621_s20 + $0x80] sm:$0xff] }
  0x18   : > { %524 = vmatmul.msk.f32.vlgmr.msra.gmra.mxu2 %vm189_vm0, %v179_v19  ;;  %525 = vmatmul.msk.f32.vlgmr.msra.gmra.mxu3 %vm189_vm0, %v179_v19  ;;  %v528_v34 = vld [vmem:[%s621_s20 + $0x88] sm:$0xff]  ;;  %v538_v35 = vld [vmem:[%s621_s20 + $0xc0] sm:$0xff] }
  0x19   : > { %424 = vmatpush.msrb.mxu3 %v545_v20  ;;  %342 = vmatpush.msrb.mxu0 %v533_v21 }
  0x1a   : > { %362 = vmatpush.msrb.mxu1 %v534_v22  ;;  %404 = vmatpush.msrb.mxu2 %v544_v23 }
  0x1b   : > { %425 = vmatpush.msrb.mxu3 %v543_v24  ;;  %343 = vmatpush.msrb.mxu0 %v531_v25 }
  0x1c   : > { %363 = vmatpush.msrb.mxu1 %v532_v26  ;;  %405 = vmatpush.msrb.mxu2 %v542_v27 }
  0x1d   : > { %426 = vmatpush.msrb.mxu3 %v541_v28  ;;  %344 = vmatpush.msrb.mxu0 %v529_v29 }
  0x1e   : > { %364 = vmatpush.msrb.mxu1 %v530_v30  ;;  %406 = vmatpush.msrb.mxu2 %v540_v31 }
  0x1f   : > { %427 = vmatpush.msrb.mxu3 %v539_v32  ;;  %345 = vmatpush.msrb.mxu0 %v527_v33 }
  0x20   : > { %365 = vmatpush.msrb.mxu1 %v528_v34  ;;  %407 = vmatpush.msrb.mxu2 %v538_v35 }
  0x21   : > { %535 = vmatmul.msk.f32.vlgmr.msrb.gmra.mxu0 %vm189_vm0, %v179_v19  ;;  %536 = vmatmul.msk.f32.vlgmr.msrb.gmra.mxu1 %vm189_vm0, %v179_v19 }
  0x22   : > { %546 = vmatmul.msk.f32.vlgmr.msrb.gmra.mxu2 %vm189_vm0, %v179_v19  ;;  %547 = vmatmul.msk.f32.vlgmr.msrb.gmra.mxu3 %vm189_vm0, %v179_v19 }
  0x23   : > { %565 = vset.pattern.permute.xlu0 %v578_v36 }
  0x24   : > { %241 = vperm.xlu0 %565, %v610_v0  }
  0x2c   : > { %567 = vset.pattern.permute.xlu0 %v577_v2 }
  0x7f   : > { %v236_v37 = vpop.permute.xlu0 %235  ;;  %v248_v43 = vpop.permute.xlu1 %247 }
  0x94   : > { %v210_v38 = vpop.f32.mrf.mxu0  ;;  %v230_v39 = vpop.f32.mrf.mxu1 }
  0x95   : > { %v238_v40 = vadd.f32 %v236_v37, %v210_v38  ;;  %v239_v41 = vadd.f32 %v236_v37, %v230_v39 }
  0x96   : > { %v242_v42 = vpop.permute.xlu0 %241 }
  0x97   : > { %v244_v44 = vmax.f32 %v238_v40, %v242_v42  ;;  %v245_v45 = vmax.f32 %v239_v41, %v242_v42 }
  0x99   : > { %v250_v46 = vadd.f32 %v248_v43, %v244_v44  ;;  %v251_v47 = vadd.f32 %v248_v43, %v245_v45 }
  0x9b   : > { %v254_v48 = vrot.slane %v251_v47, 6  ;;  %v285_v49 = vpop.f32.mrf.mxu2  ;;  %v305_v50 = vpop.f32.mrf.mxu3 }
  0x9c   : > { %v308_v51 = vadd.f32 %v285_v49, %v236_v37  ;;  %v309_v52 = vadd.f32 %v305_v50, %v236_v37 }
  0x9d   : > { %v256_v53 = vsel %vm255_vm1, %v250_v46, %v254_v48 }
  0x9e   : > { %v310_v54 = vmax.f32 %v308_v51, %v242_v42  ;;  %258 = vst [vmem:[%s672_s26] sm:$0xf] %v256_v53  ;;  %v311_v55 = vmax.f32 %v309_v52, %v242_v42  ;;  %v347_v56 = vpop.f32.mrf.mxu0  ;;  %v367_v57 = vpop.f32.mrf.mxu1 }
  0x9f   : > { %v370_v58 = vadd.f32 %v347_v56, %v236_v37  ;;  %v371_v59 = vadd.f32 %v367_v57, %v236_v37 }
  0xa0   : > { %v313_v60 = vadd.f32 %v311_v55, %v248_v43  ;;  %v312_v63 = vadd.f32 %v310_v54, %v248_v43 }
  0xa1   : > { %v372_v61 = vmax.f32 %v370_v58, %v242_v42  ;;  %v373_v62 = vmax.f32 %v371_v59, %v242_v42 }
  0xa2   : > { %v316_v0 = vrot.slane %v313_v60, 6 }
  0xa3   : > { %v375_v1 = vadd.f32 %v373_v62, %v248_v43  ;;  %v374_v3 = vadd.f32 %v372_v61, %v248_v43 }
  0xa4   : > { %v317_v2 = vsel %vm255_vm1, %v312_v63, %v316_v0 }
  0xa5   : > { %526 = vst [vmem:[%s672_s26 + $0x4] sm:$0xf] %v317_v2  ;;  %v378_v4 = vrot.slane %v375_v1, 6  ;;  %v409_v5 = vpop.f32.mrf.mxu2  ;;  %v429_v6 = vpop.f32.mrf.mxu3 }
  0xa6   : > { %v432_v7 = vadd.f32 %v409_v5, %v236_v37  ;;  %v433_v8 = vadd.f32 %v429_v6, %v236_v37 }
  0xa7   : > { %v379_v9 = vsel %vm255_vm1, %v374_v3, %v378_v4 }
  0xa8   : > { %537 = vst [vmem:[%s672_s26 + $0x8] sm:$0xf] %v379_v9  ;;  %v434_v10 = vmax.f32 %v432_v7, %v242_v42  ;;  %v435_v11 = vmax.f32 %v433_v8, %v242_v42 }
  0xaa   : > { %v437_v12 = vadd.f32 %v435_v11, %v248_v43  ;;  %v436_v13 = vadd.f32 %v434_v10, %v248_v43 }
  0xac   : > { %v440_v14 = vrot.slane %v437_v12, 6 }
  0xae   : > { %v441_v15 = vsel %vm255_vm1, %v436_v13, %v440_v14 }
  0xaf   : > { %548 = vst [vmem:[%s672_s26 + $0xc] sm:$0xf] %v441_v15 }
  0xb0 PF: > { %s13_s12 = sadd.s32 1, %s574_s12  }
  0xb1   : > { %p10_p4 = scmp.ge.s32.totalorder %s13_s12, 4  }
  0xb3   :  { %12 = sbr.rel (!%p10_p4) target bundleno = 1 (0x1), region = 68 }

</bundles_post_ra>
